<compile_context>
chip_gen: v5e
topology: v5e:2x2
jax: 0.10.0
libtpu: 0.0.40
codegen_flags: <defaults>
</compile_context>

<pallas_src>
import jax
import jax.numpy as jnp
from jax import lax
from jax.experimental import pallas as pl
from jax.experimental.pallas import tpu as pltpu


def _round_up(x, m):
    return ((x + m - 1) // m) * m


def _round_down(x, m):
    return (x // m) * m


def critic_kernel(x_ref, w1_ref, b1_ref, w2_ref, b2_ref, w3_ref, b3_ref, o_ref):
    # Layer 1, transposed / lane-dense: W1 (32, F) . x (TB, F)^T -> (32, TB).
    # A @ B^T dot_general form (no materialized transpose), f32 accumulation.
    h1t = lax.dot_general(
        w1_ref[...], x_ref[...],
        dimension_numbers=(((1,), (1,)), ((), ())),
        preferred_element_type=jnp.float32)                      # (32, TB) f32
    h1t = jnp.tanh(h1t + b1_ref[...])                            # b1 (32,1) lane-broadcast

    # Layer 2: plain (32, 32) @ (32, TB) matmul, stays lane-dense.
    h2t = jnp.dot(w2_ref[...], h1t, preferred_element_type=jnp.float32)
    h2t = jnp.tanh(h2t + b2_ref[...])                            # (32, TB)

    # Layer 3 (32 -> 1): VPU broadcast-multiply + XLU sublane reduce instead of
    # an N=1 MXU matmul; the b3 add is folded into the final store.
    out = jnp.sum(h2t * w3_ref[...], axis=0, keepdims=True)      # (1, TB)
    o_ref[...] = (out + b3_ref[...]).astype(o_ref.dtype)


def _select_batch_tile(batch, num_features, itemsize, block_batch=None):
    """Batch-tile size from the (lane-padded) feature width and a VMEM budget."""
    lane_f = max(128, _round_up(num_features, 128))   # VMEM lane padding of the x tile
    x_budget = 16 * 1024 * 1024                       # x double-buffer budget (all gens)
    tb = _round_down(x_budget // (2 * lane_f * itemsize), 128)
    tb = max(512, min(tb, 8192))
    # Keep >= 2 grid steps whenever the batch allows it so the "parallel" axis
    # actually spans both TensorCores on v7x (cheap on single-TC v5e/v6e:
    # ~0.35 us extra per grid step).
    tb = min(tb, max(128, _round_up(pl.cdiv(batch, 2), 128)))
    if block_batch is not None:
        tb = min(tb, max(128, _round_down(int(block_batch), 128)))
    return max(128, tb)


def critic_forward(x, params, *, block_batch=None):
    """x: [batch, num_features] (f32 or bf16). Returns [batch, 1] float32."""
    w1, b1, w2, b2, w3, b3 = params
    batch, nf = x.shape
    itemsize = jnp.dtype(x.dtype).itemsize

    # bf16-producer path: if x already arrives narrow we only cast the tiny
    # first-layer weight to match (no standalone astype / extra HBM round trip
    # for x). Dots accumulate in f32; biases/tanh stay f32 (safe on v5e).
    if w1.dtype != x.dtype:
        w1 = w1.astype(x.dtype)

    tb = _select_batch_tile(batch, nf, itemsize, block_batch)
    num_tiles = pl.cdiv(batch, tb)
    padded = num_tiles * tb
    lane_f = max(128, _round_up(nf, 128))

    # Explicit scoped-VMEM limit: 2x headroom over the x double buffer, the
    # (32, TB) f32 intermediates, the output block and the resident weights;
    # clamped to v7x's 64 MiB physical VMEM.
    vmem_est = (2 * tb * lane_f * itemsize               # x double buffer (lane padded)
                + 4 * 32 * tb * 4                        # (32, TB) f32 intermediates
                + 2 * 8 * tb * 4                         # (1, TB) out block, sublane padded, x2
                + 2 * 4 * (32 * lane_f + 3 * 32 * 128 + 2 * 128))   # weights / biases
    vmem_limit = int(min(64 * 1024 * 1024, max(2 * vmem_est, 8 * 1024 * 1024)))

    cost = pl.CostEstimate(
        flops=2 * batch * (nf * 32 + 32 * 32 + 32),
        transcendentals=64 * batch,
        bytes_accessed=batch * nf * itemsize + 4 * batch
        + 4 * (32 * nf + 32 * 32 + 32 + 32 + 32 + 1))

    full = lambda shape: pl.BlockSpec(shape, lambda i: (0,) * len(shape))

    out = pl.pallas_call(
        critic_kernel,
        out_shape=jax.ShapeDtypeStruct((1, padded), jnp.float32),
        grid=(num_tiles,),
        in_specs=[
            # x tile, double-buffered by BlockSpec. The ragged last tile is
            # padded by Pallas with unspecified values — safe because every
            # output column depends only on its own input column and the
            # padded columns are sliced off below (no wrapper-side jnp.pad).
            pl.BlockSpec((tb, nf), lambda i: (i, 0)),
            full(w1.shape),                     # weights: constant index_map,
            full(b1.shape),                     # stay VMEM-resident across steps
            full(w2.shape),
            full(b2.shape),
            full(w3.shape),
            full(b3.shape),
        ],
        out_specs=pl.BlockSpec((1, tb), lambda i: (0, i)),   # lane-dense output row
        compiler_params=pltpu.CompilerParams(
            dimension_semantics=("parallel",),
            vmem_limit_bytes=vmem_limit),
        cost_estimate=cost,
    )(x, w1, b1, w2, b2, w3, b3)

    # (1, padded) -> (batch, 1): cheap slice + reshape of the same row-major data.
    return out[:, :batch].reshape(batch, 1)


def init_critic_params(key, num_features):
    """torch.nn.Linear default init U(-1/sqrt(fan_in), 1/sqrt(fan_in)),
    stored in the kernel-native (transposed) layout."""
    k1, k2, k3, k4, k5, k6 = jax.random.split(key, 6)

    def uniform(k, shape, fan_in):
        bound = 1.0 / jnp.sqrt(jnp.float32(fan_in))
        return jax.random.uniform(k, shape, jnp.float32, -bound, bound)

    w1 = uniform(k1, (32, num_features), num_features)   # [out, in]
    b1 = uniform(k2, (32, 1), num_features)
    w2 = uniform(k3, (32, 32), 32)                       # [out, in]
    b2 = uniform(k4, (32, 1), 32)
    w3 = uniform(k5, (32, 1), 32)                        # [in, out]
    b3 = uniform(k6, (1, 1), 32)
    return (w1, b1, w2, b2, w3, b3)


def critic_reference(x, params):
    """Pure-JAX reference for correctness check (mirrors the PyTorch module)."""
    w1, b1, w2, b2, w3, b3 = params
    h = jnp.tanh(x @ w1.T + b1.reshape(1, -1))
    h = jnp.tanh(h @ w2.T + b2.reshape(1, -1))
    return h @ w3 + b3.reshape(1, 1)


if __name__ == "__main__":
    num_features = 16
    key = jax.random.PRNGKey(0)
    kx, kp, kx2 = jax.random.split(key, 3)
    params = init_critic_params(kp, num_features)

    # Small batch: a single 128-row tile with a ragged (Pallas-padded) edge.
    x_small = jax.random.normal(kx, (8, num_features), dtype=jnp.float32)
    out_small = jax.block_until_ready(critic_forward(x_small, params))
    ref_small = critic_reference(x_small, params)
    assert out_small.shape == (8, 1), out_small.shape
    assert jnp.allclose(out_small, ref_small, atol=1e-4, rtol=1e-4), "small-batch mismatch"

    # Ragged multi-tile batch: 3 grid steps, last tile Pallas-padded (no jnp.pad copy).
    x_big = jax.random.normal(kx2, (300, num_features), dtype=jnp.float32)
    out_big = jax.block_until_ready(critic_forward(x_big, params, block_batch=128))
    ref_big = critic_reference(x_big, params)
    assert out_big.shape == (300, 1), out_big.shape
    assert jnp.allclose(out_big, ref_big, atol=1e-4, rtol=1e-4), "multi-tile mismatch"

    # bf16-producer path: x arrives already in bf16 (no extra HBM round trip in
    # the wrapper); only the tiny W1 is cast to match, accumulation stays f32.
    x_bf16 = x_big.astype(jnp.bfloat16)
    out_bf16 = jax.block_until_ready(critic_forward(x_bf16, params, block_batch=128))
    ref_bf16 = critic_reference(
        x_bf16.astype(jnp.float32),
        (params[0].astype(jnp.bfloat16).astype(jnp.float32),) + params[1:])
    assert jnp.allclose(out_bf16, ref_bf16, atol=1e-2, rtol=1e-2), "bf16 path mismatch"

    print("KERNEL_OK")
</pallas_src>

<mosaic_0001>
module attributes {stable_mosaic.version = 11 : i64} {
  func.func @critic_kernel(%arg0: i32, %arg1: memref<128x16xf32, #tpu.memory_space<vmem>>, %arg2: memref<32x16xf32, #tpu.memory_space<vmem>>, %arg3: memref<32x1xf32, #tpu.memory_space<vmem>>, %arg4: memref<32x32xf32, #tpu.memory_space<vmem>>, %arg5: memref<32x1xf32, #tpu.memory_space<vmem>>, %arg6: memref<32x1xf32, #tpu.memory_space<vmem>>, %arg7: memref<1x1xf32, #tpu.memory_space<vmem>>, %arg8: memref<1x128xf32, #tpu.memory_space<vmem>>) attributes {dimension_semantics = [#tpu.dimension_semantics<parallel>], iteration_bounds = array<i64: 1>, scalar_prefetch = 0 : i64, scratch_operands = 0 : i64, tpu.core_type = #tpu.core_type<tc>, window_params = [{transform_indices = @transform_0, window_bounds = array<i64: 128, 16>}, {pipeline_mode = #tpu.pipeline_mode<synchronous>, transform_indices = @transform_1, window_bounds = array<i64: 32, 16>}, {pipeline_mode = #tpu.pipeline_mode<synchronous>, transform_indices = @transform_2, window_bounds = array<i64: 32, 1>}, {pipeline_mode = #tpu.pipeline_mode<synchronous>, transform_indices = @transform_3, window_bounds = array<i64: 32, 32>}, {pipeline_mode = #tpu.pipeline_mode<synchronous>, transform_indices = @transform_4, window_bounds = array<i64: 32, 1>}, {pipeline_mode = #tpu.pipeline_mode<synchronous>, transform_indices = @transform_5, window_bounds = array<i64: 32, 1>}, {pipeline_mode = #tpu.pipeline_mode<synchronous>, transform_indices = @transform_6, window_bounds = array<i64: 1, 1>}, {transform_indices = @transform_7, window_bounds = array<i64: 1, 128>}]} {
    %c0 = arith.constant 0 : index
    %c0_0 = arith.constant 0 : index
    %0 = vector.load %arg2[%c0, %c0_0] : memref<32x16xf32, #tpu.memory_space<vmem>>, vector<32x16xf32>
    %c0_1 = arith.constant 0 : index
    %c0_2 = arith.constant 0 : index
    %1 = vector.load %arg1[%c0_1, %c0_2] : memref<128x16xf32, #tpu.memory_space<vmem>>, vector<128x16xf32>
    %cst = arith.constant dense<0.000000e+00> : vector<32x128xf32>
    %2 = tpu.matmul %0, %1, %cst {dimension_numbers = #tpu.dot_dimension_numbers<[1], [1], [0], [0], [0, 0, 1, 0], [], []>} : vector<32x16xf32>, vector<128x16xf32>, vector<32x128xf32> -> vector<32x128xf32>
    %c0_3 = arith.constant 0 : index
    %c0_4 = arith.constant 0 : index
    %3 = vector.load %arg3[%c0_3, %c0_4] : memref<32x1xf32, #tpu.memory_space<vmem>>, vector<32x1xf32>
    %4 = vector.broadcast %3 : vector<32x1xf32> to vector<32x128xf32>
    %5 = arith.addf %2, %4 : vector<32x128xf32>
    %6 = math.tanh %5 : vector<32x128xf32>
    %c0_5 = arith.constant 0 : index
    %c0_6 = arith.constant 0 : index
    %7 = vector.load %arg4[%c0_5, %c0_6] : memref<32x32xf32, #tpu.memory_space<vmem>>, vector<32x32xf32>
    %cst_7 = arith.constant dense<0.000000e+00> : vector<32x128xf32>
    %8 = tpu.matmul %7, %6, %cst_7 {dimension_numbers = #tpu.dot_dimension_numbers<[1], [0], [0], [1], [0, 0, 1, 1], [], []>} : vector<32x32xf32>, vector<32x128xf32>, vector<32x128xf32> -> vector<32x128xf32>
    %c0_8 = arith.constant 0 : index
    %c0_9 = arith.constant 0 : index
    %9 = vector.load %arg5[%c0_8, %c0_9] : memref<32x1xf32, #tpu.memory_space<vmem>>, vector<32x1xf32>
    %10 = vector.broadcast %9 : vector<32x1xf32> to vector<32x128xf32>
    %11 = arith.addf %8, %10 : vector<32x128xf32>
    %12 = math.tanh %11 : vector<32x128xf32>
    %c0_10 = arith.constant 0 : index
    %c0_11 = arith.constant 0 : index
    %13 = vector.load %arg6[%c0_10, %c0_11] : memref<32x1xf32, #tpu.memory_space<vmem>>, vector<32x1xf32>
    %14 = vector.broadcast %13 : vector<32x1xf32> to vector<32x128xf32>
    %15 = arith.mulf %12, %14 : vector<32x128xf32>
    %cst_12 = arith.constant dense<0.000000e+00> : vector<128xf32>
    %16 = vector.multi_reduction <add>, %15, %cst_12 [0] : vector<32x128xf32> to vector<128xf32>
    %17 = vector.shape_cast %16 : vector<128xf32> to vector<1x128xf32>
    %c0_13 = arith.constant 0 : index
    %c0_14 = arith.constant 0 : index
    %18 = vector.load %arg7[%c0_13, %c0_14] : memref<1x1xf32, #tpu.memory_space<vmem>>, vector<1x1xf32>
    %19 = vector.broadcast %18 : vector<1x1xf32> to vector<1x128xf32>
    %20 = arith.addf %17, %19 : vector<1x128xf32>
    %c0_15 = arith.constant 0 : index
    %c0_16 = arith.constant 0 : index
    %21 = vector.load %arg8[%c0_15, %c0_16] : memref<1x128xf32, #tpu.memory_space<vmem>>, vector<1x128xf32>
    tpu.vector_store %arg8[%c0_15, %c0_16], %20 {strides = array<i32>} : memref<1x128xf32, #tpu.memory_space<vmem>>, vector<1x128xf32>,
    return
  }
  func.func @transform_0(%arg0: i32) -> (i32, i32) {
    %c0_i32 = arith.constant 0 : i32
    %c0_i32_0 = arith.constant 0 : i32
    return %arg0, %c0_i32 : i32, i32
  }
  func.func @transform_1(%arg0: i32) -> (i32, i32) {
    %c0_i32 = arith.constant 0 : i32
    %c0_i32_0 = arith.constant 0 : i32
    %c0_i32_1 = arith.constant 0 : i32
    return %c0_i32, %c0_i32_0 : i32, i32
  }
  func.func @transform_2(%arg0: i32) -> (i32, i32) {
    %c0_i32 = arith.constant 0 : i32
    %c0_i32_0 = arith.constant 0 : i32
    %c0_i32_1 = arith.constant 0 : i32
    return %c0_i32, %c0_i32_0 : i32, i32
  }
  func.func @transform_3(%arg0: i32) -> (i32, i32) {
    %c0_i32 = arith.constant 0 : i32
    %c0_i32_0 = arith.constant 0 : i32
    %c0_i32_1 = arith.constant 0 : i32
    return %c0_i32, %c0_i32_0 : i32, i32
  }
  func.func @transform_4(%arg0: i32) -> (i32, i32) {
    %c0_i32 = arith.constant 0 : i32
    %c0_i32_0 = arith.constant 0 : i32
    %c0_i32_1 = arith.constant 0 : i32
    return %c0_i32, %c0_i32_0 : i32, i32
  }
  func.func @transform_5(%arg0: i32) -> (i32, i32) {
    %c0_i32 = arith.constant 0 : i32
    %c0_i32_0 = arith.constant 0 : i32
    %c0_i32_1 = arith.constant 0 : i32
    return %c0_i32, %c0_i32_0 : i32, i32
  }
  func.func @transform_6(%arg0: i32) -> (i32, i32) {
    %c0_i32 = arith.constant 0 : i32
    %c0_i32_0 = arith.constant 0 : i32
    %c0_i32_1 = arith.constant 0 : i32
    return %c0_i32, %c0_i32_0 : i32, i32
  }
  func.func @transform_7(%arg0: i32) -> (i32, i32) {
    %c0_i32 = arith.constant 0 : i32
    %c0_i32_0 = arith.constant 0 : i32
    return %c0_i32, %arg0 : i32, i32
  }
}

</mosaic_0001>

<bundles_post_ra>
// kernel: tpu_custom_call.1
= control target key start
LH: loop header
LB: loop body
LE: loop exit
PB: predicated region body
PF: predicated region fallthrough
CT: control target
= control target key end

     0   :  { %s614_s0 = inlined_call_operand.vmem [shape: f32[8,16], index: 0, kind: input, shape index: {}]   ;;  %s615_s1 = inlined_call_operand.vmem [shape: f32[32,16], index: 1, kind: input, shape index: {}]   ;;  %s616_s2 = inlined_call_operand.vmem [shape: f32[32,1], index: 2, kind: input, shape index: {}]   ;;  %s617_s3 = inlined_call_operand.vmem [shape: f32[32,32], index: 3, kind: input, shape index: {}]   ;;  %s618_s4 = inlined_call_operand.vmem [shape: f32[32,1], index: 4, kind: input, shape index: {}]   ;;  %s619_s5 = inlined_call_operand.vmem [shape: f32[32,1], index: 5, kind: input, shape index: {}]   ;;  %s620_s6 = inlined_call_operand.<no memory space> [shape: f32[1,1], index: 6, kind: input, shape index: {}]   ;;  %s621_s7 = inlined_call_operand.hbm [shape: f32[1,128], index: 7, kind: output, shape index: {}]  }
   0x1   :  { %v12_v0 = vstv %s620_s6 }
   0x2   :  { %13 = vst [vmem:[#allocation2] sm:$0x1] %v12_v0 }
   0x3   :  { %v48_v1 = vld [vmem:[%s614_s0 + $0x78] sm:$0xff]  ;;  %vm73_vm0 = vcmask 130048   ;;  %v47_v2 = vld [vmem:[%s614_s0 + $0x70] sm:$0xff] }
   0x4   :  { %328 = vmatpush.xpose.msk.msra.mxu3 %vm73_vm0, %v48_v1  ;;  %327 = vmatpush.xpose.msk.msra.mxu2 %vm73_vm0, %v48_v1 }
   0x5   :  { %303 = vmatpush.xpose.msk.msra.mxu0 %vm73_vm0, %v48_v1 }
   0x6   :  { %14 = vsyncpa [#allocation4], 0  ;;  %v46_v3 = vld [vmem:[%s614_s0 + $0x68] sm:$0xff]  ;;  %v45_v4 = vld [vmem:[%s614_s0 + $0x60] sm:$0xff]  ;;  %v406_v8 = vmov 0   ;;  %vm195_vm1 = vcmask 261120  }
   0x7   :  { %v44_v5 = vld [vmem:[%s614_s0 + $0x58] sm:$0xff]  ;;  %v43_v7 = vld [vmem:[%s614_s0 + $0x50] sm:$0xff]  ;;  %361 = vset.pattern.permute.xlu0 %v406_v8  ;;  %362 = vset.pattern.permute.xlu1 %v406_v8  ;;  %v42_v9 = vld [vmem:[%s614_s0 + $0x48] sm:$0xff]  ;;  %s294_s23 = sshll.u32 %s621_s7, 4  ;;  %s295_s23 = int_to_ptr.hbm [resolvable:$true] %s294_s23 }
   0x8   :  { %330 = vmatpush.xpose.msk.msra.mxu3 %vm73_vm0, %v47_v2  ;;  %329 = vmatpush.xpose.msk.msra.mxu2 %vm73_vm0, %v47_v2  ;;  %v52_v6 = vld [vmem:[%s616_s2 + $0x18] sm:$0xff]  ;;  %v51_v10 = vld [vmem:[%s616_s2 + $0x10] sm:$0xff]  ;;  %v41_v11 = vld [vmem:[%s614_s0 + $0x40] sm:$0xff] }
   0x9   :  { %304 = vmatpush.xpose.msk.msra.mxu0 %vm73_vm0, %v47_v2  ;;  %70 = vperm.xlu0 %361, %v52_v6   ;;  %v50_v12 = vld [vmem:[%s616_s2 + $0x8] sm:$0xff]  ;;  %v40_v13 = vld [vmem:[%s614_s0 + $0x38] sm:$0xff]  ;;  %v173_v14 = vld [vmem:[%s618_s4 + $0x10] sm:$0xff] }
   0xa   :  { %363 = vset.pattern.permute.xlu2 %v406_v8  ;;  %60 = vperm.xlu1 %362, %v50_v12   ;;  %v39_v15 = vld [vmem:[%s614_s0 + $0x30] sm:$0xff]  ;;  %v49_v16 = vld [vmem:[%s616_s2] sm:$0xff]  ;;  %v38_v17 = vld [vmem:[%s614_s0 + $0x28] sm:$0xff] }
   0xb   :  { %v242_v18 = vld [vmem:[%s619_s5 + $0x8] sm:$0xff]  ;;  %v37_v19 = vld [vmem:[%s614_s0 + $0x20] sm:$0xff]  ;;  %v174_v20 = vld [vmem:[%s618_s4 + $0x18] sm:$0xff] }
   0xc   :  { %332 = vmatpush.xpose.msk.msra.mxu3 %vm73_vm0, %v46_v3  ;;  %331 = vmatpush.xpose.msk.msra.mxu2 %vm73_vm0, %v46_v3  ;;  %v36_v21 = vld [vmem:[%s614_s0 + $0x18] sm:$0xff]  ;;  %v278_v22 = vld [vmem:[#allocation2] sm:$0x1]  ;;  %v35_v23 = vld [vmem:[%s614_s0 + $0x10] sm:$0xff] }
   0xd   :  { %305 = vmatpush.xpose.msk.msra.mxu0 %vm73_vm0, %v46_v3  ;;  %v243_v24 = vld [vmem:[%s619_s5 + $0x10] sm:$0xff]  ;;  %v34_v25 = vld [vmem:[%s614_s0 + $0x8] sm:$0xff]  ;;  %v33_v26 = vld [vmem:[%s614_s0] sm:$0xff] }
   0xe   :  { %v31_v27 = vld [vmem:[%s615_s1 + $0x10] sm:$0xff]  ;;  %v30_v28 = vld [vmem:[%s615_s1 + $0x8] sm:$0xff]  ;;  %v29_v29 = vld [vmem:[%s615_s1] sm:$0xff] }
   0xf   :  { %v32_v30 = vld [vmem:[%s615_s1 + $0x18] sm:$0xff]  ;;  %v171_v39 = vld [vmem:[%s618_s4] sm:$0xff]  ;;  %v172_v45 = vld [vmem:[%s618_s4 + $0x8] sm:$0xff] }
  0x10   :  { %334 = vmatpush.xpose.msk.msra.mxu3 %vm73_vm0, %v45_v4  ;;  %333 = vmatpush.xpose.msk.msra.mxu2 %vm73_vm0, %v45_v4  ;;  %v167_v48 = vld [vmem:[%s617_s3] sm:$0xff]  ;;  %v168_v51 = vld [vmem:[%s617_s3 + $0x8] sm:$0xff]  ;;  %v244_v52 = vld [vmem:[%s619_s5 + $0x18] sm:$0xff] }
  0x11   :  { %306 = vmatpush.xpose.msk.msra.mxu0 %vm73_vm0, %v45_v4  ;;  %65 = vperm.xlu0 %361, %v51_v10   ;;  %v241_v50 = vld [vmem:[%s619_s5] sm:$0xff]  ;;  %v169_v53 = vld [vmem:[%s617_s3 + $0x10] sm:$0xff]  ;;  %v170_v54 = vld [vmem:[%s617_s3 + $0x18] sm:$0xff]  ;;  %s407_s3 = smov [#allocation3]  }
  0x12   :  { %55 = vperm.xlu1 %362, %v49_v16   ;;  %177 = vperm.xlu2 %363, %v171_v39   ;;  %s292_s5 = sshll.u32 %s407_s3, 4  ;;  %s293_s5 = int_to_ptr.vmem [resolvable:$true] %s292_s5 }
  0x14   :  { %336 = vmatpush.xpose.msk.msra.mxu3 %vm73_vm0, %v44_v5  ;;  %335 = vmatpush.xpose.msk.msra.mxu2 %vm73_vm0, %v44_v5 }
  0x15   :  { %307 = vmatpush.xpose.msk.msra.mxu0 %vm73_vm0, %v44_v5 }
  0x18   :  { %338 = vmatpush.xpose.msk.msra.mxu3 %vm73_vm0, %v43_v7  ;;  %337 = vmatpush.xpose.msk.msra.mxu2 %vm73_vm0, %v43_v7 }
  0x19   :  { %308 = vmatpush.xpose.msk.msra.mxu0 %vm73_vm0, %v43_v7  ;;  %187 = vperm.xlu0 %361, %v173_v14  }
  0x1a   :  { %192 = vperm.xlu1 %362, %v174_v20   ;;  %182 = vperm.xlu2 %363, %v172_v45  }
  0x1c   :  { %340 = vmatpush.xpose.msk.msra.mxu3 %vm73_vm0, %v42_v9  ;;  %339 = vmatpush.xpose.msk.msra.mxu2 %vm73_vm0, %v42_v9 }
  0x1d   :  { %309 = vmatpush.xpose.msk.msra.mxu0 %vm73_vm0, %v42_v9 }
  0x20   :  { %342 = vmatpush.xpose.msk.msra.mxu3 %vm73_vm0, %v41_v11  ;;  %341 = vmatpush.xpose.msk.msra.mxu2 %vm73_vm0, %v41_v11 }
  0x21   :  { %310 = vmatpush.xpose.msk.msra.mxu0 %vm73_vm0, %v41_v11  ;;  %252 = vperm.xlu0 %361, %v242_v18  }
  0x22   :  { %257 = vperm.xlu1 %362, %v243_v24   ;;  %247 = vperm.xlu2 %363, %v241_v50  }
  0x24   :  { %344 = vmatpush.xpose.msk.msra.mxu3 %vm73_vm0, %v40_v13  ;;  %343 = vmatpush.xpose.msk.msra.mxu2 %vm73_vm0, %v40_v13 }
  0x25   :  { %311 = vmatpush.xpose.msk.msra.mxu0 %vm73_vm0, %v40_v13 }
  0x28   :  { %346 = vmatpush.xpose.msk.msra.mxu3 %vm73_vm0, %v39_v15  ;;  %345 = vmatpush.xpose.msk.msra.mxu2 %vm73_vm0, %v39_v15 }
  0x29   :  { %312 = vmatpush.xpose.msk.msra.mxu0 %vm73_vm0, %v39_v15  ;;  %281 = vperm.xlu0 %361, %v278_v22  }
  0x2a   :  { %262 = vperm.xlu2 %363, %v244_v52  }
  0x2c   :  { %348 = vmatpush.xpose.msk.msra.mxu3 %vm73_vm0, %v38_v17  ;;  %347 = vmatpush.xpose.msk.msra.mxu2 %vm73_vm0, %v38_v17 }
  0x2d   :  { %313 = vmatpush.xpose.msk.msra.mxu0 %vm73_vm0, %v38_v17 }
  0x30   :  { %350 = vmatpush.xpose.msk.msra.mxu3 %vm73_vm0, %v37_v19  ;;  %349 = vmatpush.xpose.msk.msra.mxu2 %vm73_vm0, %v37_v19 }
  0x31   :  { %314 = vmatpush.xpose.msk.msra.mxu0 %vm73_vm0, %v37_v19 }
  0x34   :  { %352 = vmatpush.xpose.msk.msra.mxu3 %vm73_vm0, %v36_v21  ;;  %351 = vmatpush.xpose.msk.msra.mxu2 %vm73_vm0, %v36_v21 }
  0x35   :  { %315 = vmatpush.xpose.msk.msra.mxu0 %vm73_vm0, %v36_v21 }
  0x38   :  { %354 = vmatpush.xpose.msk.msra.mxu3 %vm73_vm0, %v35_v23  ;;  %353 = vmatpush.xpose.msk.msra.mxu2 %vm73_vm0, %v35_v23 }
  0x39   :  { %316 = vmatpush.xpose.msk.msra.mxu0 %vm73_vm0, %v35_v23 }
  0x3c   :  { %356 = vmatpush.xpose.msk.msra.mxu3 %vm73_vm0, %v34_v25  ;;  %355 = vmatpush.xpose.msk.msra.mxu2 %vm73_vm0, %v34_v25 }
  0x3d   :  { %317 = vmatpush.xpose.msk.msra.mxu0 %vm73_vm0, %v34_v25 }
  0x40   :  { %358 = vmatpush.xpose.msk.msra.mxu3 %vm73_vm0, %v33_v26  ;;  %357 = vmatpush.xpose.msk.msra.mxu2 %vm73_vm0, %v33_v26 }
  0x41   :  { %318 = vmatpush.xpose.msk.msra.mxu0 %vm73_vm0, %v33_v26 }
  0x43   :  { %321 = vmatmul.msk.f32.vlgmr.msra.gmra.mxu3 %vm73_vm0, %v31_v27  ;;  %320 = vmatmul.msk.f32.vlgmr.msra.gmra.mxu2 %vm73_vm0, %v30_v28 }
  0x44   :  { %319 = vmatmul.msk.f32.vlgmr.msra.gmra.mxu0 %vm73_vm0, %v29_v29 }
  0x4b   :  { %322 = vmatmul.msk.f32.gmra.mxu3 %vm73_vm0, %v32_v30 }
  0x6c   :  { %v178_v56 = vpop.permute.xlu2 %177 }
  0x74   :  { %v183_v58 = vpop.permute.xlu2 %182 }
  0x7b   :  { %v71_v31 = vpop.permute.xlu0 %70 }
  0x7c   :  { %v61_v33 = vpop.permute.xlu1 %60  ;;  %v248_v1 = vpop.permute.xlu2 %247 }
  0x83   :  { %v66_v34 = vpop.permute.xlu0 %65 }
  0x84   :  { %v56_v42 = vpop.permute.xlu1 %55  ;;  %v263_v14 = vpop.permute.xlu2 %262 }
  0x8b   :  { %v188_v60 = vpop.permute.xlu0 %187 }
  0x8c   :  { %v193_v0 = vpop.permute.xlu1 %192 }
  0x93   :  { %v253_v7 = vpop.permute.xlu0 %252 }
  0x94   :  { %v258_v9 = vpop.permute.xlu1 %257 }
  0x9b   :  { %v282_v22 = vpop.permute.xlu0 %281 }
  0x9c   :  { %v284_v24 = vperm.slane %v282_v22, 0 }
  0xc1   :  { %v151_v40 = vpop.f32.mrf.mxu0 }
  0xc2   :  { %v152_v43 = vadd.f32 %v151_v40, %v56_v42 }
  0xc6   :  { %v157_v32 = vpop.f32.mrf.mxu3  ;;  %v154_v35 = vpop.f32.mrf.mxu2 }
  0xc7   :  { %v158_v37 = vadd.f32 %v157_v32, %v66_v34  ;;  %v155_v41 = vadd.f32 %v154_v35, %v61_v33 }
  0xce   :  { %v160_v36 = vpop.f32.mrf.mxu3 }
  0xcf   :  { %v161_v38 = vadd.f32 %v160_v36, %v71_v31 }
  0xd1   :  { %364 = vtanh.f32 %v161_v38 }
  0xd2   :  { %366 = vtanh.f32 %v158_v37 }
  0xd3   :  { %368 = vtanh.f32 %v155_v41 }
  0xd4   :  { %370 = vtanh.f32 %v152_v43 }
  0xd7   :  { %v365_v44 = vpop.eup %364 }
  0xd8   :  { %220 = vmatpush.msra.mxu1 %v365_v44  ;;  %v367_v46 = vpop.eup %366 }
  0xd9   :  { %v369_v47 = vpop.eup %368 }
  0xda   :  { %221 = vmatpush.msra.mxu1 %v367_v46  ;;  %v371_v49 = vpop.eup %370 }
  0xdc   :  { %222 = vmatpush.msra.mxu1 %v369_v47 }
  0xde   :  { %223 = vmatpush.msra.mxu1 %v371_v49 }
  0xdf   :  { %323 = vmatmul.msk.f32.vlgmr.msra.gmra.mxu1 %vm195_vm1, %v167_v48 }
  0xe7   :  { %324 = vmatmul.msk.f32.gmra.mxu1 %vm195_vm1, %v168_v51 }
  0xef   :  { %325 = vmatmul.msk.f32.gmra.mxu1 %vm195_vm1, %v169_v53 }
  0xf7   :  { %326 = vmatmul.msk.f32.gmra.mxu1 %vm195_vm1, %v170_v54 }
 0x15c   :  { %v225_v55 = vpop.f32.mrf.mxu1 }
 0x15d   :  { %v226_v61 = vadd.f32 %v225_v55, %v178_v56 }
 0x164   :  { %v228_v57 = vpop.f32.mrf.mxu1 }
 0x165   :  { %v229_v59 = vadd.f32 %v228_v57, %v183_v58 }
 0x167   :  { %372 = vtanh.f32 %v229_v59 }
 0x168   :  { %374 = vtanh.f32 %v226_v61 }
 0x16c   :  { %v231_v62 = vpop.f32.mrf.mxu1 }
 0x16d   :  { %v232_v63 = vadd.f32 %v231_v62, %v188_v60  ;;  %v373_v3 = vpop.eup %372 }
 0x16e   :  { %v375_v5 = vpop.eup %374  ;;  %v266_v8 = vmul.f32 %v373_v3, %v253_v7 }
 0x16f   :  { %376 = vtanh.f32 %v232_v63  ;;  %v265_v10 = vmul.f32 %v375_v5, %v248_v1 }
 0x171   :  { %v269_v12 = vadd.f32 %v266_v8, %v265_v10 }
 0x174   :  { %v234_v2 = vpop.f32.mrf.mxu1 }
 0x175   :  { %v235_v4 = vadd.f32 %v234_v2, %v193_v0  ;;  %v377_v6 = vpop.eup %376 }
 0x176   :  { %v267_v11 = vmul.f32 %v377_v6, %v258_v9 }
 0x177   :  { %378 = vtanh.f32 %v235_v4 }
 0x178   :  { %v270_v15 = vadd.f32 %v269_v12, %v267_v11 }
 0x17d   :  { %v379_v13 = vpop.eup %378 }
 0x17e   :  { %v268_v16 = vmul.f32 %v379_v13, %v263_v14 }
 0x180   :  { %v271_v17 = vadd.f32 %v270_v15, %v268_v16 }
 0x182   :  { %v272_v18 = vrot.slane %v271_v17, 4 }
 0x184   :  { %v273_v19 = vadd.f32 %v272_v18, %v271_v17 }
 0x186   :  { %v274_v20 = vrot.slane %v273_v19, 2 }
 0x188   :  { %v275_v21 = vadd.f32 %v274_v20, %v273_v19 }
 0x18a   :  { %v276_v23 = vrot.slane %v275_v21, 1 }
 0x18c   :  { %v277_v25 = vadd.f32 %v276_v23, %v275_v21 }
 0x18e   :  { %v285_v26 = vadd.f32 %v284_v24, %v277_v25 }
 0x190   :  { %286 = vst [vmem:[#allocation3] sm:$0x1] %v285_v26 }
 0x191   :  { %297 = dma.vmem_to_hbm [thread:$0]  %s293_s5, 16, %s295_s23, [#allocation4]  }
 0x192   :  { %404 = dma.done.wait [#allocation4], 16  }
 0x193   :  { %405 = vsyncadd [#allocation4], 4294967280 }
 0x194   :  { %302 = vsyncpa [#allocation4], 1 }

</bundles_post_ra>
